<compile_context>
chip_gen: v6e
topology: v6e:2x2x1
jax: 0.10.0
libtpu: 0.0.40
codegen_flags: <defaults>
</compile_context>

<pallas_src>
import functools

import jax
import jax.numpy as jnp
from jax import lax
from jax.experimental import pallas as pl
from jax.experimental.pallas import tpu as pltpu


def _round_up(x, m):
    return (x + m - 1) // m * m


# ----------------------------------------------------------------------------
# Kernel 1: K projection  (k = memory_features @ Wk^T + bk), bf16 output.
# ----------------------------------------------------------------------------
def _kproj_kernel(mem_ref, wk_ref, bk_ref, k_ref):
    mem = mem_ref[...]                     # (tile_m, H) bf16
    wk = wk_ref[...]                       # (H, H)      bf16  (PyTorch (out, in))
    # mem @ Wk^T  -> contract dim 1 of mem with dim 1 of Wk (no in-kernel transpose)
    k = lax.dot_general(mem, wk, (((1,), (1,)), ((), ())),
                        preferred_element_type=jnp.float32)
    k = k + bk_ref[...]                    # (tile_m, H) f32
    k_ref[...] = k.astype(k_ref.dtype)


# ----------------------------------------------------------------------------
# Kernel 2: per-N-tile attention + augmentation.
#   q     = f_tile @ Wq^T + bq
#   attn  = softmax(q @ k^T / sqrt(H))
#   aug   = attn @ memory_features
# ----------------------------------------------------------------------------
def _fan_kernel(f_ref, k_ref, mem_ref, wq_ref, bq_ref, out_ref):
    H = f_ref.shape[-1]
    scale = 1.0 / (H ** 0.5)

    f_bf = f_ref[...].astype(jnp.bfloat16)            # (tile_n, H)
    wq_bf = wq_ref[...]                                # (H, H) bf16

    # q = f @ Wq^T + bq   (nn.Linear semantics; contract dim 1 with dim 1)
    q = lax.dot_general(f_bf, wq_bf, (((1,), (1,)), ((), ())),
                        preferred_element_type=jnp.float32)
    q = q + bq_ref[...]                                # (tile_n, H) f32

    # scores = q @ k^T / sqrt(H)
    k_bf = k_ref[...]                                  # (M, H) bf16
    scores = lax.dot_general(q.astype(jnp.bfloat16), k_bf,
                             (((1,), (1,)), ((), ())),
                             preferred_element_type=jnp.float32)
    scores = scores * scale                            # (tile_n, M)

    # numerically-stable softmax along M
    m = jnp.max(scores, axis=-1, keepdims=True)
    p = jnp.exp(scores - m)
    denom = jnp.sum(p, axis=-1, keepdims=True)
    attn = p * pl.reciprocal(denom, approx=True)

    # aug = attn @ memory_features   (v = unprojected memory, as in the module)
    mem_bf = mem_ref[...]                              # (M, H) bf16
    aug = jnp.dot(attn.astype(jnp.bfloat16), mem_bf,
                  preferred_element_type=jnp.float32)

    out_ref[...] = aug.astype(out_ref.dtype)


# ----------------------------------------------------------------------------
# Wrapper: parameter layout, tiling, padding, concat, label pass-through.
# ----------------------------------------------------------------------------
def feature_augmentation_cat(features, labels, memory_features, memory_labels, params):
    """Pallas implementation of FeatureAugmentationNetworkCat.forward."""
    del memory_labels  # unused by the PyTorch forward
    N, H = features.shape
    M, _ = memory_features.shape

    f32, bf16 = jnp.float32, jnp.bfloat16

    wq = params["q_proj_w"].astype(bf16)               # (H, H) PyTorch (out, in)
    bq = params["q_proj_b"].reshape(1, H).astype(f32)
    wk = params["k_proj_w"].astype(bf16)
    bk = params["k_proj_b"].reshape(1, H).astype(f32)
    # note: v_proj exists in the module's __init__ but is unused in forward.

    mem_bf = memory_features.astype(bf16)

    # ---- Kernel 1: project K once (not per N tile) -------------------------
    tile_m = 256 if (M >= 256 and M % 256 == 0) else M
    k_bf = pl.pallas_call(
        _kproj_kernel,
        out_shape=jax.ShapeDtypeStruct((M, H), bf16),
        grid=(M // tile_m,),
        in_specs=[
            pl.BlockSpec((tile_m, H), lambda i: (i, 0)),   # memory tile
            pl.BlockSpec((H, H), lambda i: (0, 0)),        # Wk (resident)
            pl.BlockSpec((1, H), lambda i: (0, 0)),        # bk (resident)
        ],
        out_specs=pl.BlockSpec((tile_m, H), lambda i: (i, 0)),
        compiler_params=pltpu.CompilerParams(
            dimension_semantics=("parallel",)),
        cost_estimate=pl.CostEstimate(
            flops=2 * M * H * H,
            transcendentals=0,
            bytes_accessed=M * H * 2 + H * H * 2 + H * 4 + M * H * 2),
    )(mem_bf, wk, bk)

    # ---- Kernel 2: attention + augmentation, tiled over N ------------------
    tile_n = min(256, _round_up(N, 8))
    n_pad = _round_up(N, tile_n)
    feats_p = features if n_pad == N else jnp.pad(
        features, ((0, n_pad - N), (0, 0)))

    aug = pl.pallas_call(
        _fan_kernel,
        out_shape=jax.ShapeDtypeStruct((n_pad, H), f32),
        grid=(n_pad // tile_n,),
        in_specs=[
            pl.BlockSpec((tile_n, H), lambda i: (i, 0)),   # features tile
            pl.BlockSpec((M, H), lambda i: (0, 0)),        # projected K (resident)
            pl.BlockSpec((M, H), lambda i: (0, 0)),        # memory bank (resident)
            pl.BlockSpec((H, H), lambda i: (0, 0)),        # Wq (resident)
            pl.BlockSpec((1, H), lambda i: (0, 0)),        # bq (resident)
        ],
        out_specs=pl.BlockSpec((tile_n, H), lambda i: (i, 0)),
        compiler_params=pltpu.CompilerParams(
            dimension_semantics=("parallel",)),
        cost_estimate=pl.CostEstimate(
            flops=2 * n_pad * H * H + 4 * n_pad * M * H,
            transcendentals=n_pad * M,
            bytes_accessed=(n_pad * H * 4          # features in
                            + 2 * M * H * 2        # k + memory (bf16)
                            + H * H * 2 + H * 4    # Wq, bq
                            + n_pad * H * 4),      # aug out
        ),
    )(feats_p, k_bf, mem_bf, wq, bq)

    aug = aug[:N]
    # Cheap copy/concat done by XLA outside the kernel (saves kernel HBM traffic).
    augmented_features = jnp.concatenate([features, aug], axis=-1)
    augmented_labels = labels  # pass-through, identical to the PyTorch module
    return augmented_features, augmented_labels


# ----------------------------------------------------------------------------
# Synthetic parameters + pure-JAX reference
# ----------------------------------------------------------------------------
def init_params(hidden_size, key):
    ks = jax.random.split(key, 6)
    bound = 1.0 / (hidden_size ** 0.5)
    u = lambda k, shape: jax.random.uniform(k, shape, jnp.float32, -bound, bound)
    return {
        "q_proj_w": u(ks[0], (hidden_size, hidden_size)),
        "q_proj_b": u(ks[1], (hidden_size,)),
        "k_proj_w": u(ks[2], (hidden_size, hidden_size)),
        "k_proj_b": u(ks[3], (hidden_size,)),
        # v_proj is initialized (as in __init__) but unused by forward:
        "v_proj_w": u(ks[4], (hidden_size, hidden_size)),
        "v_proj_b": u(ks[5], (hidden_size,)),
    }


def _reference(features, memory_features, params):
    H = features.shape[-1]
    q = features @ params["q_proj_w"].T + params["q_proj_b"]
    k = memory_features @ params["k_proj_w"].T + params["k_proj_b"]
    attn = jax.nn.softmax((q @ k.T) / jnp.sqrt(jnp.float32(H)), axis=-1)
    aug = attn @ memory_features
    return jnp.concatenate([features, aug], axis=-1)


if __name__ == "__main__":
    hidden_size = 32
    N, M = 8, 16

    key = jax.random.PRNGKey(0)
    k_feat, k_mem, k_params = jax.random.split(key, 3)

    features = jax.random.normal(k_feat, (N, hidden_size), jnp.float32)
    memory_features = jax.random.normal(k_mem, (M, hidden_size), jnp.float32)
    labels = jnp.arange(N, dtype=jnp.int32)
    memory_labels = jnp.arange(M, dtype=jnp.int32)

    params = init_params(hidden_size, k_params)

    fwd = jax.jit(functools.partial(feature_augmentation_cat, params=params))
    aug_feats, aug_labels = fwd(features, labels, memory_features, memory_labels)
    aug_feats = jax.block_until_ready(aug_feats)
    aug_labels = jax.block_until_ready(aug_labels)

    ref = _reference(features, memory_features, params)
    assert aug_feats.shape == (N, 2 * hidden_size)
    # Left half is an exact pass-through of features.
    assert jnp.array_equal(aug_feats[:, :hidden_size], features)
    # bf16 MXU operands + approx reciprocal -> slightly loosened tolerance.
    assert jnp.allclose(aug_feats, ref, atol=5e-2, rtol=5e-2)
    assert jnp.array_equal(aug_labels, labels)

    print("KERNEL_OK")
</pallas_src>

<mosaic_0001>
module attributes {stable_mosaic.version = 11 : i64} {
  func.func @_kproj_kernel(%arg0: i32, %arg1: memref<16x32xbf16, #tpu.memory_space<vmem>>, %arg2: memref<32x32xbf16, #tpu.memory_space<vmem>>, %arg3: memref<1x32xf32, #tpu.memory_space<vmem>>, %arg4: memref<16x32xbf16, #tpu.memory_space<vmem>>) attributes {dimension_semantics = [#tpu.dimension_semantics<parallel>], iteration_bounds = array<i64: 1>, scalar_prefetch = 0 : i64, scratch_operands = 0 : i64, tpu.core_type = #tpu.core_type<tc>, window_params = [{transform_indices = @transform_0, window_bounds = array<i64: 16, 32>}, {pipeline_mode = #tpu.pipeline_mode<synchronous>, transform_indices = @transform_1, window_bounds = array<i64: 32, 32>}, {pipeline_mode = #tpu.pipeline_mode<synchronous>, transform_indices = @transform_2, window_bounds = array<i64: 1, 32>}, {transform_indices = @transform_3, window_bounds = array<i64: 16, 32>}]} {
    %c0 = arith.constant 0 : index
    %c0_0 = arith.constant 0 : index
    %0 = vector.load %arg1[%c0, %c0_0] : memref<16x32xbf16, #tpu.memory_space<vmem>>, vector<16x32xbf16>
    %c0_1 = arith.constant 0 : index
    %c0_2 = arith.constant 0 : index
    %1 = vector.load %arg2[%c0_1, %c0_2] : memref<32x32xbf16, #tpu.memory_space<vmem>>, vector<32x32xbf16>
    %cst = arith.constant dense<0.000000e+00> : vector<16x32xf32>
    %2 = tpu.matmul %0, %1, %cst {dimension_numbers = #tpu.dot_dimension_numbers<[1], [1], [0], [0], [0, 0, 1, 0], [], []>} : vector<16x32xbf16>, vector<32x32xbf16>, vector<16x32xf32> -> vector<16x32xf32>
    %c0_3 = arith.constant 0 : index
    %c0_4 = arith.constant 0 : index
    %3 = vector.load %arg3[%c0_3, %c0_4] : memref<1x32xf32, #tpu.memory_space<vmem>>, vector<1x32xf32>
    %4 = vector.broadcast %3 : vector<1x32xf32> to vector<16x32xf32>
    %5 = arith.addf %2, %4 : vector<16x32xf32>
    %6 = arith.truncf %5 : vector<16x32xf32> to vector<16x32xbf16>
    %c0_5 = arith.constant 0 : index
    %c0_6 = arith.constant 0 : index
    %7 = vector.load %arg4[%c0_5, %c0_6] : memref<16x32xbf16, #tpu.memory_space<vmem>>, vector<16x32xbf16>
    tpu.vector_store %arg4[%c0_5, %c0_6], %6 {strides = array<i32>} : memref<16x32xbf16, #tpu.memory_space<vmem>>, vector<16x32xbf16>,
    return
  }
  func.func @transform_0(%arg0: i32) -> (i32, i32) {
    %c0_i32 = arith.constant 0 : i32
    %c0_i32_0 = arith.constant 0 : i32
    return %arg0, %c0_i32 : i32, i32
  }
  func.func @transform_1(%arg0: i32) -> (i32, i32) {
    %c0_i32 = arith.constant 0 : i32
    %c0_i32_0 = arith.constant 0 : i32
    %c0_i32_1 = arith.constant 0 : i32
    return %c0_i32, %c0_i32_0 : i32, i32
  }
  func.func @transform_2(%arg0: i32) -> (i32, i32) {
    %c0_i32 = arith.constant 0 : i32
    %c0_i32_0 = arith.constant 0 : i32
    %c0_i32_1 = arith.constant 0 : i32
    return %c0_i32, %c0_i32_0 : i32, i32
  }
  func.func @transform_3(%arg0: i32) -> (i32, i32) {
    %c0_i32 = arith.constant 0 : i32
    %c0_i32_0 = arith.constant 0 : i32
    return %arg0, %c0_i32 : i32, i32
  }
}

module attributes {stable_mosaic.version = 11 : i64} {
  func.func @_fan_kernel(%arg0: i32, %arg1: memref<8x32xf32, #tpu.memory_space<vmem>>, %arg2: memref<16x32xbf16, #tpu.memory_space<vmem>>, %arg3: memref<16x32xbf16, #tpu.memory_space<vmem>>, %arg4: memref<32x32xbf16, #tpu.memory_space<vmem>>, %arg5: memref<1x32xf32, #tpu.memory_space<vmem>>, %arg6: memref<8x32xf32, #tpu.memory_space<vmem>>) attributes {dimension_semantics = [#tpu.dimension_semantics<parallel>], iteration_bounds = array<i64: 1>, scalar_prefetch = 0 : i64, scratch_operands = 0 : i64, tpu.core_type = #tpu.core_type<tc>, window_params = [{transform_indices = @transform_0, window_bounds = array<i64: 8, 32>}, {pipeline_mode = #tpu.pipeline_mode<synchronous>, transform_indices = @transform_1, window_bounds = array<i64: 16, 32>}, {pipeline_mode = #tpu.pipeline_mode<synchronous>, transform_indices = @transform_2, window_bounds = array<i64: 16, 32>}, {pipeline_mode = #tpu.pipeline_mode<synchronous>, transform_indices = @transform_3, window_bounds = array<i64: 32, 32>}, {pipeline_mode = #tpu.pipeline_mode<synchronous>, transform_indices = @transform_4, window_bounds = array<i64: 1, 32>}, {transform_indices = @transform_5, window_bounds = array<i64: 8, 32>}]} {
    %c0 = arith.constant 0 : index
    %c0_0 = arith.constant 0 : index
    %0 = vector.load %arg1[%c0, %c0_0] : memref<8x32xf32, #tpu.memory_space<vmem>>, vector<8x32xf32>
    %1 = arith.truncf %0 : vector<8x32xf32> to vector<8x32xbf16>
    %c0_1 = arith.constant 0 : index
    %c0_2 = arith.constant 0 : index
    %2 = vector.load %arg4[%c0_1, %c0_2] : memref<32x32xbf16, #tpu.memory_space<vmem>>, vector<32x32xbf16>
    %cst = arith.constant dense<0.000000e+00> : vector<8x32xf32>
    %3 = tpu.matmul %1, %2, %cst {dimension_numbers = #tpu.dot_dimension_numbers<[1], [1], [0], [0], [0, 0, 1, 0], [], []>} : vector<8x32xbf16>, vector<32x32xbf16>, vector<8x32xf32> -> vector<8x32xf32>
    %c0_3 = arith.constant 0 : index
    %c0_4 = arith.constant 0 : index
    %4 = vector.load %arg5[%c0_3, %c0_4] : memref<1x32xf32, #tpu.memory_space<vmem>>, vector<1x32xf32>
    %5 = vector.broadcast %4 : vector<1x32xf32> to vector<8x32xf32>
    %6 = arith.addf %3, %5 : vector<8x32xf32>
    %c0_5 = arith.constant 0 : index
    %c0_6 = arith.constant 0 : index
    %7 = vector.load %arg2[%c0_5, %c0_6] : memref<16x32xbf16, #tpu.memory_space<vmem>>, vector<16x32xbf16>
    %8 = arith.truncf %6 : vector<8x32xf32> to vector<8x32xbf16>
    %cst_7 = arith.constant dense<0.000000e+00> : vector<8x16xf32>
    %9 = tpu.matmul %8, %7, %cst_7 {dimension_numbers = #tpu.dot_dimension_numbers<[1], [1], [0], [0], [0, 0, 1, 0], [], []>} : vector<8x32xbf16>, vector<16x32xbf16>, vector<8x16xf32> -> vector<8x16xf32>
    %cst_8 = arith.constant 0.176776692 : f32
    %10 = vector.broadcast %cst_8 : f32 to vector<8x16xf32>
    %11 = arith.mulf %9, %10 : vector<8x16xf32>
    %cst_9 = arith.constant dense<0xFF800000> : vector<8xf32>
    %12 = vector.multi_reduction <maximumf>, %11, %cst_9 [1] : vector<8x16xf32> to vector<8xf32>
    %13 = vector.shape_cast %12 : vector<8xf32> to vector<8x1xf32>
    %14 = vector.broadcast %13 : vector<8x1xf32> to vector<8x16xf32>
    %15 = arith.subf %11, %14 : vector<8x16xf32>
    %16 = math.exp %15 : vector<8x16xf32>
    %cst_10 = arith.constant dense<0.000000e+00> : vector<8xf32>
    %17 = vector.multi_reduction <add>, %16, %cst_10 [1] : vector<8x16xf32> to vector<8xf32>
    %18 = vector.shape_cast %17 : vector<8xf32> to vector<8x1xf32>
    %19 = tpu.reciprocal %18 {approx = true} : vector<8x1xf32> -> vector<8x1xf32>
    %20 = vector.broadcast %19 : vector<8x1xf32> to vector<8x16xf32>
    %21 = arith.mulf %16, %20 : vector<8x16xf32>
    %c0_11 = arith.constant 0 : index
    %c0_12 = arith.constant 0 : index
    %22 = vector.load %arg3[%c0_11, %c0_12] : memref<16x32xbf16, #tpu.memory_space<vmem>>, vector<16x32xbf16>
    %23 = arith.truncf %21 : vector<8x16xf32> to vector<8x16xbf16>
    %cst_13 = arith.constant dense<0.000000e+00> : vector<8x32xf32>
    %24 = tpu.matmul %23, %22, %cst_13 {dimension_numbers = #tpu.dot_dimension_numbers<[1], [0], [0], [1], [0, 0, 1, 1], [], []>} : vector<8x16xbf16>, vector<16x32xbf16>, vector<8x32xf32> -> vector<8x32xf32>
    %c0_14 = arith.constant 0 : index
    %c0_15 = arith.constant 0 : index
    %25 = vector.load %arg6[%c0_14, %c0_15] : memref<8x32xf32, #tpu.memory_space<vmem>>, vector<8x32xf32>
    tpu.vector_store %arg6[%c0_14, %c0_15], %24 {strides = array<i32>} : memref<8x32xf32, #tpu.memory_space<vmem>>, vector<8x32xf32>,
    return
  }
  func.func @transform_0(%arg0: i32) -> (i32, i32) {
    %c0_i32 = arith.constant 0 : i32
    %c0_i32_0 = arith.constant 0 : i32
    return %arg0, %c0_i32 : i32, i32
  }
  func.func @transform_1(%arg0: i32) -> (i32, i32) {
    %c0_i32 = arith.constant 0 : i32
    %c0_i32_0 = arith.constant 0 : i32
    %c0_i32_1 = arith.constant 0 : i32
    return %c0_i32, %c0_i32_0 : i32, i32
  }
  func.func @transform_2(%arg0: i32) -> (i32, i32) {
    %c0_i32 = arith.constant 0 : i32
    %c0_i32_0 = arith.constant 0 : i32
    %c0_i32_1 = arith.constant 0 : i32
    return %c0_i32, %c0_i32_0 : i32, i32
  }
  func.func @transform_3(%arg0: i32) -> (i32, i32) {
    %c0_i32 = arith.constant 0 : i32
    %c0_i32_0 = arith.constant 0 : i32
    %c0_i32_1 = arith.constant 0 : i32
    return %c0_i32, %c0_i32_0 : i32, i32
  }
  func.func @transform_4(%arg0: i32) -> (i32, i32) {
    %c0_i32 = arith.constant 0 : i32
    %c0_i32_0 = arith.constant 0 : i32
    %c0_i32_1 = arith.constant 0 : i32
    return %c0_i32, %c0_i32_0 : i32, i32
  }
  func.func @transform_5(%arg0: i32) -> (i32, i32) {
    %c0_i32 = arith.constant 0 : i32
    %c0_i32_0 = arith.constant 0 : i32
    return %arg0, %c0_i32 : i32, i32
  }
}

</mosaic_0001>

<bundles_post_ra>
// kernel: feature_augmentation_cat.2
= control target key start
LH: loop header
LB: loop body
LE: loop exit
PB: predicated region body
PF: predicated region fallthrough
CT: control target
= control target key end

     0   :  { %vm43_vm0 = vcmask 261120   ;;  %v134_v0 = vmov 0.0   ;;  %vm135_vm1 = vmmov 0   ;;  %vm102_vm2 = vcmask 257024   ;;  %s174_s1 = inlined_call_operand.vmem [shape: bf16[32,32], index: 1, kind: input, shape index: {}]   ;;  %s175_s0 = inlined_call_operand.vmem [shape: bf16[16,32], index: 0, kind: input, shape index: {}]   ;;  %s176_s2 = inlined_call_operand.vmem [shape: f32[1,32], index: 2, kind: input, shape index: {}]   ;;  %s177_s3 = inlined_call_operand.vmem [shape: bf16[16,32], index: 3, kind: output, shape index: {}]  }
   0x1   :  { %121 = vmatprep.subr.bf16.mxu0 %v134_v0  ;;  %v131_v1 = vld [vmem:[%s174_s1 + $0x8] sm:$0xff]   ;;  %125 = vmatprep.mubr.msk.bf16.mxu0 %vm135_vm1, %v134_v0  ;;  %v132_v3 = vld [vmem:[%s174_s1] sm:$0xff]  }
   0x2   :  { %v51_v2 = vsel %vm43_vm0, %v131_v1, 0  ;;  %v48_v4 = vsel %vm43_vm0, %v132_v3, 0  ;;  %v133_v5 = vld [vmem:[%s175_s0] sm:$0xff]  }
   0x3   :  { %122 = vmatpush3.bf16.xpose.msra.mxu0 %v51_v2  ;;  %v109_v6 = vld [vmem:[%s176_s2] ss:$0 sm:$0xff] }
   0x4   :  { %123 = vmatprep.subr.bf16.mxu0 %v134_v0 }
   0xb   :  { %124 = vmatpush3.bf16.xpose.msra.mxu0 %v48_v4 }
  0x12   :  { %126 = vmatmul.mubr.msk.bf16.vlgmr.msra.gmra.mxu0 %vm43_vm0, %v133_v5 }
  0xd2   :  { %v87_v7 = vpop.f32.mrf.mxu0 }
  0xd3   :  { %v88_v8 = vadd.f32 %v109_v6, %v87_v7 }
  0xd4   :  { %v127_v9 = vpop.f32.mrf.mxu0 }
  0xd5   :  { %v116_v10 = vpack.c.bf16 %v88_v8, %v88_v8 }
  0xd6   :  { %v90_v11 = vpop.f32.mrf.mxu0 }
  0xd7   :  { %103 = vst.msk [vmem:[%s177_s3] sm:$0xf] %vm102_vm2, %v116_v10  ;;  %v91_v12 = vadd.f32 %v109_v6, %v90_v11 }
  0xd8   :  { %v128_v13 = vpop.f32.mrf.mxu0 }
  0xd9   :  { %v117_v14 = vpack.c.bf16 %v91_v12, %v91_v12 }
  0xdb   :  { %104 = vst.msk [vmem:[%s177_s3 + $0x4] sm:$0xf] %vm102_vm2, %v117_v14 }

// kernel: feature_augmentation_cat.3
= control target key start
LH: loop header
LB: loop body
LE: loop exit
PB: predicated region body
PF: predicated region fallthrough
CT: control target
= control target key end

     0   :  { %vm44_vm0 = vcmask 261120   ;;  %v263_v0 = vmov 0.0   ;;  %vm264_vm1 = vmmov 0   ;;  %vm149_vm2 = vcmask 130048   ;;  %s328_s3 = inlined_call_operand.vmem [shape: bf16[32,32], index: 3, kind: input, shape index: {}]   ;;  %s329_s1 = inlined_call_operand.vmem [shape: bf16[16,32], index: 1, kind: input, shape index: {}]   ;;  %s330_s0 = inlined_call_operand.vmem [shape: f32[8,32], index: 0, kind: input, shape index: {}]   ;;  %s331_s4 = inlined_call_operand.vmem [shape: f32[1,32], index: 4, kind: input, shape index: {}]   ;;  %s332_s2 = inlined_call_operand.vmem [shape: bf16[16,32], index: 2, kind: input, shape index: {}]   ;;  %s333_s5 = inlined_call_operand.vmem [shape: f32[8,32], index: 5, kind: output, shape index: {}]  }
   0x1   :  { %233 = vmatprep.subr.bf16.mxu0 %v263_v0  ;;  %v255_v1 = vld [vmem:[%s328_s3 + $0x8] sm:$0xff]   ;;  %237 = vmatprep.mubr.msk.bf16.mxu0 %vm264_vm1, %v263_v0  ;;  %v257_v3 = vld [vmem:[%s329_s1] sm:$0xff]  }
   0x2   :  { %241 = vmatprep.subr.bf16.mxu1 %v263_v0  ;;  %243 = vmatprep.mubr.msk.bf16.mxu1 %vm264_vm1, %v263_v0  ;;  %v52_v2 = vsel %vm44_vm0, %v255_v1, 0  ;;  %v256_v4 = vld [vmem:[%s328_s3] sm:$0xff]   ;;  %v106_v5 = vsel %vm44_vm0, %v257_v3, 0 }
   0x3   :  { %234 = vmatpush3.bf16.xpose.msra.mxu0 %v52_v2  ;;  %242 = vmatpush3.bf16.xpose.msra.mxu1 %v106_v5  ;;  %v49_v6 = vsel %vm44_vm0, %v256_v4, 0  ;;  %v21_v7 = vld [vmem:[%s330_s0] sm:$0xff] }
   0x4   :  { %235 = vmatprep.subr.bf16.mxu0 %v263_v0  ;;  %247 = vmatprep.subr.bf16.mxu1 %v263_v0  ;;  %v22_v8 = vpack.c.bf16 %v21_v7, %v21_v7  ;;  %v218_v9 = vld [vmem:[%s331_s4] ss:$0 sm:$0xff] }
   0x5   :  { %v258_v27 = vld [vmem:[%s332_s2] sm:$0xff]  }
   0xb   :  { %236 = vmatpush3.bf16.xpose.msra.mxu0 %v49_v6 }
  0x12   :  { %238 = vmatmul.mubr.msk.bf16.vlgmr.msra.gmra.mxu0 %vm44_vm0, %v22_v8 }
  0xd2   :  { %v88_v10 = vpop.f32.mrf.mxu0 }
  0xd3   :  { %v89_v11 = vadd.f32 %v218_v9, %v88_v10 }
  0xd4   :  { %v239_v12 = vpop.f32.mrf.mxu0 }
  0xd5   :  { %v96_v13 = vpack.c.bf16 %v89_v11, %v89_v11 }
  0xd6   :  { %v91_v14 = vpop.f32.mrf.mxu0 }
  0xd7   :  { %244 = vmatmul.mubr.msk.bf16.vlgmr.msra.gmra.mxu1 %vm44_vm0, %v96_v13 }
  0xd8   :  { %v240_v15 = vpop.f32.mrf.mxu0  ;;  %249 = vmatprep.mubr.msk.bf16.mxu1 %vm264_vm1, %v263_v0  ;;  %248 = vmatpush3.bf16.msra.mxu1 %v258_v27 }
 0x197   :  { %v142_v16 = vpop.f32.mrf.mxu1 }
 0x198   :  { %v148_v17 = vmul.f32 0.17677669, %v142_v16 }
 0x199   :  { %v245_v18 = vpop.f32.mrf.mxu1 }
 0x19a   :  { %v150_v19 = vsel %vm149_vm2, %v148_v17, -inf }
 0x19b   :  { %151 = vmax.xlane.f32.xlu0 %v150_v19  ;;  %v145_v20 = vpop.f32.mrf.mxu1 }
 0x19d   :  { %v246_v21 = vpop.f32.mrf.mxu1 }
 0x224   :  { %v152_v22 = vpop.xlane.xlu0 %151 }
 0x225   :  { %v153_v23 = vsub.f32 %v148_v17, %v152_v22 }
 0x227   :  { %v154_v24 = vmul.f32 1.442695, %v153_v23 }
 0x229   :  { %259 = vpow2.f32 %v154_v24 }
 0x236   :  { %v260_v25 = vpop.eup %259 }
 0x237   :  { %v156_v26 = vsel %vm149_vm2, %v260_v25, 0.0 }
 0x238   :  { %157 = vadd.xlane.f32.xlu0 %v156_v26 }
 0x2c1   :  { %v158_v28 = vpop.xlane.xlu0 %157 }
 0x2c2   :  { %261 = vrcp.f32 %v158_v28 }
 0x2cf   :  { %v262_v29 = vpop.eup %261 }
 0x2d0   :  { %v160_v30 = vmul.f32 %v262_v29, %v260_v25 }
 0x2d2   :  { %v163_v31 = vpack.c.bf16 %v160_v30, %v160_v30 }
 0x2d4   :  { %250 = vmatmul.mubr.msk.bf16.vlgmr.msra.gmra.mxu1 %vm149_vm2, %v163_v31 }
 0x394   :  { %v207_v32 = vpop.f32.mrf.mxu1 }
 0x395   :  { %213 = vst.msk [vmem:[%s333_s5] sm:$0xff] %vm44_vm0, %v207_v32 }
 0x396   :  { %v251_v33 = vpop.f32.mrf.mxu1 }
 0x398   :  { %v210_v34 = vpop.f32.mrf.mxu1 }
 0x39a   :  { %v252_v35 = vpop.f32.mrf.mxu1 }

</bundles_post_ra>
